<compile_context>
chip_gen: v6e
topology: v6e:2x2x1
jax: 0.10.0
libtpu: 0.0.40
codegen_flags: <defaults>
</compile_context>

<pallas_src>
import functools

import jax
import jax.numpy as jnp
from jax.experimental import pallas as pl
from jax.experimental.pallas import tpu as pltpu

HIDDEN = 128  # fixed by the PyTorch module


def _round_up(x, m):
    return (x + m - 1) // m * m


# --------------------------------------------------------------------------
# Kernel 1: features + fused value/advantage streams (one tile of the batch)
# --------------------------------------------------------------------------
def dueling_streams_kernel(
    x_ref,
    w1_ref, b1_ref,
    w2_ref, b2_ref,
    wva_ref, bva_ref,
    whead_ref, bhead_ref,
    head_ref,
):
    """Output layout (lane-dense, 128-padded):
       col 0          : V(s)
       cols 1..out    : A(s, a)
       col out+1      : sum_a A(s, a)   (baked into the fused head weights)
       remaining cols : 0
    """
    x = x_ref[...]                                                    # (TB, IN) f32

    # feature layer (bf16 operands on the MXU, f32 accumulation, f32 bias/ReLU)
    h1 = jnp.dot(x.astype(jnp.bfloat16), w1_ref[...],
                 preferred_element_type=jnp.float32) + b1_ref[...]
    h1 = jnp.maximum(h1, 0.0)                                         # (TB, 128)

    feats = jnp.dot(h1.astype(jnp.bfloat16), w2_ref[...],
                    preferred_element_type=jnp.float32) + b2_ref[...]
    feats = jnp.maximum(feats, 0.0)                                   # (TB, 128)

    # fused value|advantage hidden layer: single (128, 256) matmul
    hva = jnp.dot(feats.astype(jnp.bfloat16), wva_ref[...],
                  preferred_element_type=jnp.float32) + bva_ref[...]
    hva = jnp.maximum(hva, 0.0)                                       # (TB, 256)

    # fused block-diagonal head: single (256, 128) matmul, lane-dense output
    head = jnp.dot(hva.astype(jnp.bfloat16), whead_ref[...],
                   preferred_element_type=jnp.float32) + bhead_ref[...]
    head_ref[...] = head                                              # (TB, 128)


# --------------------------------------------------------------------------
# Kernel 2: lightweight finalize — apply the global dueling combine
# --------------------------------------------------------------------------
def dueling_combine_kernel(adv_sum_ref, head_ref, out_ref, *, inv_count):
    # mean over ALL advantage entries (batch * out_dim), matching PyTorch's
    # advantages.mean(); inv_count is a precomputed reciprocal constant.
    adv_mean = adv_sum_ref[0, 0] * inv_count
    head = head_ref[...]
    values = head[:, 0:1]                               # (TB, 1)
    # q = V + (A - mean); computed on the whole padded block, the useful
    # columns (1..out_dim) are sliced out in the wrapper.
    out_ref[...] = values + head - adv_mean


# --------------------------------------------------------------------------
# Host-side, one-time weight fusion + bf16 cast
# --------------------------------------------------------------------------
def fuse_params(params):
    out_dim = params["wa2"].shape[1]
    head_w = _round_up(out_dim + 2, 128)           # lane-dense head width

    w_va = jnp.concatenate([params["wv1"], params["wa1"]], axis=1)    # (128, 256)
    b_va = jnp.concatenate([params["bv1"], params["ba1"]], axis=1)    # (1, 256)

    w_head = jnp.zeros((2 * HIDDEN, head_w), jnp.float32)
    w_head = w_head.at[:HIDDEN, 0:1].set(params["wv2"])               # value col
    w_head = w_head.at[HIDDEN:, 1:1 + out_dim].set(params["wa2"])     # adv cols
    w_head = w_head.at[HIDDEN:, 1 + out_dim].set(jnp.sum(params["wa2"], axis=1))
    b_head = jnp.zeros((1, head_w), jnp.float32)
    b_head = b_head.at[0, 0].set(params["bv2"][0, 0])
    b_head = b_head.at[0, 1:1 + out_dim].set(params["ba2"][0])
    b_head = b_head.at[0, 1 + out_dim].set(jnp.sum(params["ba2"]))

    bf16 = jnp.bfloat16
    return dict(
        w1=params["w1"].astype(bf16), b1=params["b1"],
        w2=params["w2"].astype(bf16), b2=params["b2"],
        w_va=w_va.astype(bf16), b_va=b_va,
        w_head=w_head.astype(bf16), b_head=b_head,
        out_dim=out_dim, head_w=head_w,
    )


# --------------------------------------------------------------------------
# Wrapper
# --------------------------------------------------------------------------
def dueling_dqn_forward(state, fused, *, tile_b=512):
    """state: (B, input_dim) f32.  fused: output of fuse_params()."""
    B, in_dim = state.shape
    out_dim = fused["out_dim"]
    head_w = fused["head_w"]

    # Batch tiling.  TB=512 keeps the double-buffered f32 activation blocks at
    # ~0.5 MiB and resident bf16 weights at ~160 KiB — comfortably within the
    # 32 MiB scoped VMEM budget on v7x (and trivially on v5e/v6e's 128 MiB).
    tb = min(tile_b, _round_up(B, 8))
    b_pad = _round_up(B, tb)
    nb = b_pad // tb
    x = jnp.pad(state, ((0, b_pad - B), (0, 0)))

    resident = lambda shape: pl.BlockSpec(shape, lambda i: (0, 0))  # VMEM-resident

    head = pl.pallas_call(
        dueling_streams_kernel,
        out_shape=jax.ShapeDtypeStruct((b_pad, head_w), jnp.float32),
        grid=(nb,),
        in_specs=[
            pl.BlockSpec((tb, in_dim), lambda i: (i, 0)),
            resident((in_dim, HIDDEN)), resident((1, HIDDEN)),
            resident((HIDDEN, HIDDEN)), resident((1, HIDDEN)),
            resident((HIDDEN, 2 * HIDDEN)), resident((1, 2 * HIDDEN)),
            resident((2 * HIDDEN, head_w)), resident((1, head_w)),
        ],
        out_specs=pl.BlockSpec((tb, head_w), lambda i: (i, 0)),
        compiler_params=pltpu.CompilerParams(dimension_semantics=("parallel",)),
    )(x, fused["w1"], fused["b1"], fused["w2"], fused["b2"],
      fused["w_va"], fused["b_va"], fused["w_head"], fused["b_head"])

    # Cross-tile reduction for the *global* advantage mean.  The per-row
    # advantage sums came out of the fused head matmul for free (column
    # out_dim+1); only the real rows [:B] contribute.  This is O(B) scalar
    # work between two "parallel"-gridded kernels.
    adv_sum = jnp.sum(head[:B, 1 + out_dim]).reshape(1, 1)

    inv_count = 1.0 / float(B * out_dim)          # precomputed reciprocal
    q_pad = pl.pallas_call(
        functools.partial(dueling_combine_kernel, inv_count=inv_count),
        out_shape=jax.ShapeDtypeStruct((b_pad, head_w), jnp.float32),
        grid=(nb,),
        in_specs=[
            pl.BlockSpec(memory_space=pltpu.MemorySpace.SMEM),   # scalar adv_sum
            pl.BlockSpec((tb, head_w), lambda i: (i, 0)),
        ],
        out_specs=pl.BlockSpec((tb, head_w), lambda i: (i, 0)),
        compiler_params=pltpu.CompilerParams(dimension_semantics=("parallel",)),
    )(adv_sum, head)

    # lane-dense padded output; slice to (B, out_dim) outside the kernel
    return q_pad[:B, 1:1 + out_dim]


# --------------------------------------------------------------------------
# Init / reference (pure f32, matches the PyTorch module)
# --------------------------------------------------------------------------
def init_params(key, input_dim, output_dim, hidden=HIDDEN):
    def linear(k, fan_in, fan_out):
        kw, kb = jax.random.split(k)
        bound = 1.0 / jnp.sqrt(jnp.float32(fan_in))
        w = jax.random.uniform(kw, (fan_in, fan_out), jnp.float32, -bound, bound)
        b = jax.random.uniform(kb, (1, fan_out), jnp.float32, -bound, bound)
        return w, b

    keys = jax.random.split(key, 6)
    w1, b1 = linear(keys[0], input_dim, hidden)
    w2, b2 = linear(keys[1], hidden, hidden)
    wv1, bv1 = linear(keys[2], hidden, hidden)
    wv2, bv2 = linear(keys[3], hidden, 1)
    wa1, ba1 = linear(keys[4], hidden, hidden)
    wa2, ba2 = linear(keys[5], hidden, output_dim)
    return dict(w1=w1, b1=b1, w2=w2, b2=b2,
                wv1=wv1, bv1=bv1, wv2=wv2, bv2=bv2,
                wa1=wa1, ba1=ba1, wa2=wa2, ba2=ba2)


def reference_forward(state, p):
    h = jnp.maximum(state @ p["w1"] + p["b1"], 0.0)
    f = jnp.maximum(h @ p["w2"] + p["b2"], 0.0)
    v = jnp.maximum(f @ p["wv1"] + p["bv1"], 0.0) @ p["wv2"] + p["bv2"]
    a = jnp.maximum(f @ p["wa1"] + p["ba1"], 0.0) @ p["wa2"] + p["ba2"]
    return v + (a - jnp.mean(a))


if __name__ == "__main__":
    key = jax.random.PRNGKey(0)
    k_params, k_state = jax.random.split(key)

    batch = 16          # small, but > tile_b so the batch grid is exercised
    input_dim = 8       # input_dim[0] in the PyTorch module
    output_dim = 4
    tile_b = 8

    params = init_params(k_params, input_dim, output_dim)
    fused = fuse_params(params)
    state = jax.random.normal(k_state, (batch, input_dim), dtype=jnp.float32)

    qvals = dueling_dqn_forward(state, fused, tile_b=tile_b)
    qvals = jax.block_until_ready(qvals)

    ref = reference_forward(state, params)
    assert qvals.shape == (batch, output_dim), qvals.shape
    # bf16 weights/activations on the MXU (f32 accumulation) vs. pure-f32 ref
    assert jnp.allclose(qvals, ref, atol=5e-2, rtol=5e-2), (qvals, ref)

    print("KERNEL_OK")
</pallas_src>

<mosaic_0001>
module attributes {stable_mosaic.version = 11 : i64} {
  func.func @dueling_streams_kernel(%arg0: i32, %arg1: memref<8x8xf32, #tpu.memory_space<vmem>>, %arg2: memref<8x128xbf16, #tpu.memory_space<vmem>>, %arg3: memref<1x128xf32, #tpu.memory_space<vmem>>, %arg4: memref<128x128xbf16, #tpu.memory_space<vmem>>, %arg5: memref<1x128xf32, #tpu.memory_space<vmem>>, %arg6: memref<128x256xbf16, #tpu.memory_space<vmem>>, %arg7: memref<1x256xf32, #tpu.memory_space<vmem>>, %arg8: memref<256x128xbf16, #tpu.memory_space<vmem>>, %arg9: memref<1x128xf32, #tpu.memory_space<vmem>>, %arg10: memref<8x128xf32, #tpu.memory_space<vmem>>) attributes {dimension_semantics = [#tpu.dimension_semantics<parallel>], iteration_bounds = array<i64: 2>, scalar_prefetch = 0 : i64, scratch_operands = 0 : i64, tpu.core_type = #tpu.core_type<tc>, window_params = [{transform_indices = @transform_0, window_bounds = array<i64: 8, 8>}, {pipeline_mode = #tpu.pipeline_mode<synchronous>, transform_indices = @transform_1, window_bounds = array<i64: 8, 128>}, {pipeline_mode = #tpu.pipeline_mode<synchronous>, transform_indices = @transform_2, window_bounds = array<i64: 1, 128>}, {pipeline_mode = #tpu.pipeline_mode<synchronous>, transform_indices = @transform_3, window_bounds = array<i64: 128, 128>}, {pipeline_mode = #tpu.pipeline_mode<synchronous>, transform_indices = @transform_4, window_bounds = array<i64: 1, 128>}, {pipeline_mode = #tpu.pipeline_mode<synchronous>, transform_indices = @transform_5, window_bounds = array<i64: 128, 256>}, {pipeline_mode = #tpu.pipeline_mode<synchronous>, transform_indices = @transform_6, window_bounds = array<i64: 1, 256>}, {pipeline_mode = #tpu.pipeline_mode<synchronous>, transform_indices = @transform_7, window_bounds = array<i64: 256, 128>}, {pipeline_mode = #tpu.pipeline_mode<synchronous>, transform_indices = @transform_8, window_bounds = array<i64: 1, 128>}, {transform_indices = @transform_9, window_bounds = array<i64: 8, 128>}]} {
    %c0 = arith.constant 0 : index
    %c0_0 = arith.constant 0 : index
    %0 = vector.load %arg1[%c0, %c0_0] : memref<8x8xf32, #tpu.memory_space<vmem>>, vector<8x8xf32>
    %1 = arith.truncf %0 : vector<8x8xf32> to vector<8x8xbf16>
    %c0_1 = arith.constant 0 : index
    %c0_2 = arith.constant 0 : index
    %2 = vector.load %arg2[%c0_1, %c0_2] : memref<8x128xbf16, #tpu.memory_space<vmem>>, vector<8x128xbf16>
    %cst = arith.constant dense<0.000000e+00> : vector<8x128xf32>
    %3 = tpu.matmul %1, %2, %cst {dimension_numbers = #tpu.dot_dimension_numbers<[1], [0], [0], [1], [0, 0, 1, 1], [], []>} : vector<8x8xbf16>, vector<8x128xbf16>, vector<8x128xf32> -> vector<8x128xf32>
    %c0_3 = arith.constant 0 : index
    %c0_4 = arith.constant 0 : index
    %4 = vector.load %arg3[%c0_3, %c0_4] : memref<1x128xf32, #tpu.memory_space<vmem>>, vector<1x128xf32>
    %5 = vector.broadcast %4 : vector<1x128xf32> to vector<8x128xf32>
    %6 = arith.addf %3, %5 : vector<8x128xf32>
    %cst_5 = arith.constant 0.000000e+00 : f32
    %7 = vector.broadcast %cst_5 : f32 to vector<8x128xf32>
    %8 = arith.maximumf %6, %7 : vector<8x128xf32>
    %9 = arith.truncf %8 : vector<8x128xf32> to vector<8x128xbf16>
    %c0_6 = arith.constant 0 : index
    %c0_7 = arith.constant 0 : index
    %10 = vector.load %arg4[%c0_6, %c0_7] : memref<128x128xbf16, #tpu.memory_space<vmem>>, vector<128x128xbf16>
    %cst_8 = arith.constant dense<0.000000e+00> : vector<8x128xf32>
    %11 = tpu.matmul %9, %10, %cst_8 {dimension_numbers = #tpu.dot_dimension_numbers<[1], [0], [0], [1], [0, 0, 1, 1], [], []>} : vector<8x128xbf16>, vector<128x128xbf16>, vector<8x128xf32> -> vector<8x128xf32>
    %c0_9 = arith.constant 0 : index
    %c0_10 = arith.constant 0 : index
    %12 = vector.load %arg5[%c0_9, %c0_10] : memref<1x128xf32, #tpu.memory_space<vmem>>, vector<1x128xf32>
    %13 = vector.broadcast %12 : vector<1x128xf32> to vector<8x128xf32>
    %14 = arith.addf %11, %13 : vector<8x128xf32>
    %cst_11 = arith.constant 0.000000e+00 : f32
    %15 = vector.broadcast %cst_11 : f32 to vector<8x128xf32>
    %16 = arith.maximumf %14, %15 : vector<8x128xf32>
    %17 = arith.truncf %16 : vector<8x128xf32> to vector<8x128xbf16>
    %c0_12 = arith.constant 0 : index
    %c0_13 = arith.constant 0 : index
    %18 = vector.load %arg6[%c0_12, %c0_13] : memref<128x256xbf16, #tpu.memory_space<vmem>>, vector<128x256xbf16>
    %cst_14 = arith.constant dense<0.000000e+00> : vector<8x256xf32>
    %19 = tpu.matmul %17, %18, %cst_14 {dimension_numbers = #tpu.dot_dimension_numbers<[1], [0], [0], [1], [0, 0, 1, 1], [], []>} : vector<8x128xbf16>, vector<128x256xbf16>, vector<8x256xf32> -> vector<8x256xf32>
    %c0_15 = arith.constant 0 : index
    %c0_16 = arith.constant 0 : index
    %20 = vector.load %arg7[%c0_15, %c0_16] : memref<1x256xf32, #tpu.memory_space<vmem>>, vector<1x256xf32>
    %21 = vector.broadcast %20 : vector<1x256xf32> to vector<8x256xf32>
    %22 = arith.addf %19, %21 : vector<8x256xf32>
    %cst_17 = arith.constant 0.000000e+00 : f32
    %23 = vector.broadcast %cst_17 : f32 to vector<8x256xf32>
    %24 = arith.maximumf %22, %23 : vector<8x256xf32>
    %25 = arith.truncf %24 : vector<8x256xf32> to vector<8x256xbf16>
    %c0_18 = arith.constant 0 : index
    %c0_19 = arith.constant 0 : index
    %26 = vector.load %arg8[%c0_18, %c0_19] : memref<256x128xbf16, #tpu.memory_space<vmem>>, vector<256x128xbf16>
    %cst_20 = arith.constant dense<0.000000e+00> : vector<8x128xf32>
    %27 = tpu.matmul %25, %26, %cst_20 {dimension_numbers = #tpu.dot_dimension_numbers<[1], [0], [0], [1], [0, 0, 1, 1], [], []>} : vector<8x256xbf16>, vector<256x128xbf16>, vector<8x128xf32> -> vector<8x128xf32>
    %c0_21 = arith.constant 0 : index
    %c0_22 = arith.constant 0 : index
    %28 = vector.load %arg9[%c0_21, %c0_22] : memref<1x128xf32, #tpu.memory_space<vmem>>, vector<1x128xf32>
    %29 = vector.broadcast %28 : vector<1x128xf32> to vector<8x128xf32>
    %30 = arith.addf %27, %29 : vector<8x128xf32>
    %c0_23 = arith.constant 0 : index
    %c0_24 = arith.constant 0 : index
    %31 = vector.load %arg10[%c0_23, %c0_24] : memref<8x128xf32, #tpu.memory_space<vmem>>, vector<8x128xf32>
    tpu.vector_store %arg10[%c0_23, %c0_24], %30 {strides = array<i32>} : memref<8x128xf32, #tpu.memory_space<vmem>>, vector<8x128xf32>,
    return
  }
  func.func @transform_0(%arg0: i32) -> (i32, i32) {
    %c0_i32 = arith.constant 0 : i32
    %c0_i32_0 = arith.constant 0 : i32
    return %arg0, %c0_i32 : i32, i32
  }
  func.func @transform_1(%arg0: i32) -> (i32, i32) {
    %c0_i32 = arith.constant 0 : i32
    %c0_i32_0 = arith.constant 0 : i32
    %c0_i32_1 = arith.constant 0 : i32
    return %c0_i32, %c0_i32_0 : i32, i32
  }
  func.func @transform_2(%arg0: i32) -> (i32, i32) {
    %c0_i32 = arith.constant 0 : i32
    %c0_i32_0 = arith.constant 0 : i32
    %c0_i32_1 = arith.constant 0 : i32
    return %c0_i32, %c0_i32_0 : i32, i32
  }
  func.func @transform_3(%arg0: i32) -> (i32, i32) {
    %c0_i32 = arith.constant 0 : i32
    %c0_i32_0 = arith.constant 0 : i32
    %c0_i32_1 = arith.constant 0 : i32
    return %c0_i32, %c0_i32_0 : i32, i32
  }
  func.func @transform_4(%arg0: i32) -> (i32, i32) {
    %c0_i32 = arith.constant 0 : i32
    %c0_i32_0 = arith.constant 0 : i32
    %c0_i32_1 = arith.constant 0 : i32
    return %c0_i32, %c0_i32_0 : i32, i32
  }
  func.func @transform_5(%arg0: i32) -> (i32, i32) {
    %c0_i32 = arith.constant 0 : i32
    %c0_i32_0 = arith.constant 0 : i32
    %c0_i32_1 = arith.constant 0 : i32
    return %c0_i32, %c0_i32_0 : i32, i32
  }
  func.func @transform_6(%arg0: i32) -> (i32, i32) {
    %c0_i32 = arith.constant 0 : i32
    %c0_i32_0 = arith.constant 0 : i32
    %c0_i32_1 = arith.constant 0 : i32
    return %c0_i32, %c0_i32_0 : i32, i32
  }
  func.func @transform_7(%arg0: i32) -> (i32, i32) {
    %c0_i32 = arith.constant 0 : i32
    %c0_i32_0 = arith.constant 0 : i32
    %c0_i32_1 = arith.constant 0 : i32
    return %c0_i32, %c0_i32_0 : i32, i32
  }
  func.func @transform_8(%arg0: i32) -> (i32, i32) {
    %c0_i32 = arith.constant 0 : i32
    %c0_i32_0 = arith.constant 0 : i32
    %c0_i32_1 = arith.constant 0 : i32
    return %c0_i32, %c0_i32_0 : i32, i32
  }
  func.func @transform_9(%arg0: i32) -> (i32, i32) {
    %c0_i32 = arith.constant 0 : i32
    %c0_i32_0 = arith.constant 0 : i32
    return %arg0, %c0_i32 : i32, i32
  }
}

</mosaic_0001>

<bundles_post_ra>
// kernel: tpu_custom_call.1
= control target key start
LH: loop header
LB: loop body
LE: loop exit
PB: predicated region body
PF: predicated region fallthrough
CT: control target
= control target key end

     0   :  { %14 = vsyncpa [#allocation3], 0  ;;  %s1589_s0 = inlined_call_operand.vmem [shape: f32[16,8], index: 0, kind: input, shape index: {}]   ;;  %s1590_s1 = inlined_call_operand.vmem [shape: bf16[8,128], index: 1, kind: input, shape index: {}]   ;;  %s1591_s2 = inlined_call_operand.vmem [shape: f32[1,128], index: 2, kind: input, shape index: {}]   ;;  %s1592_s3 = inlined_call_operand.hbm [shape: bf16[128,128], index: 3, kind: input, shape index: {}]   ;;  %s1593_s4 = inlined_call_operand.vmem [shape: f32[1,128], index: 4, kind: input, shape index: {}]   ;;  %s1594_s5 = inlined_call_operand.hbm [shape: bf16[128,256], index: 5, kind: input, shape index: {}]   ;;  %s1595_s6 = inlined_call_operand.vmem [shape: f32[1,256], index: 6, kind: input, shape index: {}]   ;;  %s1596_s7 = inlined_call_operand.hbm [shape: bf16[256,128], index: 7, kind: input, shape index: {}]   ;;  %s1597_s8 = inlined_call_operand.vmem [shape: f32[1,128], index: 8, kind: input, shape index: {}]   ;;  %s1598_s9 = inlined_call_operand.hbm [shape: f32[16,128], index: 9, kind: output, shape index: {}]  }
   0x1   :  { %15 = vsyncpa [#allocation6], 0 }
   0x2   :  { %16 = vsyncpa [#allocation4], 0 }
   0x3   :  { %18 = vsyncpa [#allocation4 + $0x1], 0  ;;  %s1432_s30 = smov 0   ;;  %s1434_s10 = smov 0  }
   0x4   :  { %s1436_s11 = smov 0   ;;  %s1438_s12 = smov 0  }
   0x5 LB: > { %s1453_s13 = sadd.s32 4294967295, %s1369_s12   ;;  %s979_s14 = sadd.s32 4294967294, %s1369_s12   ;;  %s1369_s12 = sphi %s1438_s12, %s1614_s12   ;;  %s1365_s11 = sphi %s1436_s11, %s1613_s11   ;;  %s1361_s10 = sphi %s1434_s10, %s1612_s10   ;;  %s1357_s30 = sphi %s1432_s30, %s1611_s30  }
   0x6   : > { %s1457_s15 = sadd.s32 1, %s1369_s12   ;;  %s225_s16 = sadd.s32 1, %s1365_s11 }
   0x7   : > { %s222_s17 = ssub.s32 %s1369_s12, %s1457_s15  ;;  %p235_p0 = scmp.ne.s32.totalorder %s1365_s11, %s1361_s10 }
   0x8   : > { %p223_p1 = scmp.eq.s32.totalorder %s222_s17, 0  ;;  %p236_p2 = scmp.eq.s32.totalorder %s1453_s13, 1 }
   0x9   : > { %p241_p3 = scmp.ne.s32.totalorder %s1361_s10, %s1357_s30  ;;  %p242_p4 = scmp.eq.s32.totalorder %s979_s14, 1 }
   0xa   : > { %s1468_s18 = scalar_select %p223_p1, %s1365_s11, %s225_s16  }
   0xb   : > { %p1470_p5 = por %p236_p2, %p235_p0  ;;  %p1474_p6 = por %p242_p4, %p241_p3 }
   0xc   : > { %1600 = sst [smem:[#allocation12_spill]] %s1468_s18  ;;  %p980_p7 = scmp.ge.s32.totalorder %s1369_s12, 1 }
   0xd   : > { %s1602_s20 = scalar_select %p1474_p6, 1, 0 }
   0xe   : > { %p249_p8 = scmp.lt.s32.totalorder %s1369_s12, 3  ;;  %p1599_p9 = scmp.eq.s32.totalorder %s1453_s13, 0 }
   0xf   : > { %s1371_s22 = smov [#allocation5]   ;;  %s1372_s25 = smov [#allocation2]  }
  0x10   : > { %p1481_p10 = pnand %p980_p7, %p249_p8  ;;  %s283_s23 = sshll.u32 %s1371_s22, 4  ;;  %s284_s23 = int_to_ptr.vmem [resolvable:$true] %s283_s23 }
  0x11   : > { %s267_s26 = sshll.u32 %s1372_s25, 4  ;;  %s1234_s27 = scalar_lea.vmem %s284_s23, 2048  ;;  %s268_s26 = int_to_ptr.vmem [resolvable:$true] %s267_s26 }
  0x12   : > { %p1112_p11 = pneg %p1481_p10  ;;  %p1235_p0 = scmp.ne.s32.totalorder %s284_s23, %s1234_s27 }
  0x13   : > { %p1242_p3 = scmp.lt.s32.totalorder %s284_s23, %s284_s23  ;;  %p1243_p4 = scmp.lt.s32.totalorder %s1234_s27, %s1234_s27 }
  0x14   : > { %p1489_p12 = pnand %p1599_p9, %p1112_p11 }
  0x15   : > { %p1244_p7 = por %p1243_p4, %p1242_p3 }
  0x16   : > { %p1225_p13 = pneg %p1489_p12 }
  0x18   : > { %p1237_p1 = pnand %p1235_p0, %p1225_p13 }
  0x1a   : > { %p1238_p2 = pneg %p1237_p1 }
  0x1c   : > { %p1245_p8 = pnand %p1244_p7, %p1238_p2 }
  0x1e   : > { %1248 = shalt.err (!%p1245_p8)
}
  0x1f   : > { %s1373_s28 = smov 128   ;;  %s1374_s29 = smov 8  }
  0x20   : > { %1118 = dma.hbm_to_vmem [thread:$0]  (!%p1489_p12), %s1594_s5, 2048, %s284_s23, [#allocation6], %s1373_s28, %s1373_s28, %s1374_s29  }
  0x21   : > { %s1260_s17 = scalar_lea.vmem %s268_s26, 1024  ;;  %p1268_p9 = scmp.lt.s32.totalorder %s268_s26, %s268_s26 }
  0x22   : > { %p1261_p11 = scmp.ne.s32.totalorder %s268_s26, %s1260_s17  ;;  %p1269_p6 = scmp.lt.s32.totalorder %s1260_s17, %s1260_s17 }
  0x24   : > { %p1263_p0 = pnand %p1261_p11, %p1225_p13  ;;  %p1270_p3 = por %p1269_p6, %p1268_p9 }
  0x26   : > { %p1264_p1 = pneg %p1263_p0 }
  0x28   : > { %p1271_p2 = pnand %p1270_p3, %p1264_p1 }
  0x2a   : > { %1274 = shalt.err (!%p1271_p2)
}
  0x2b   : > { %s1375_s22 = smov 64   ;;  %s1376_s25 = smov 4  }
  0x2c   : > { %1115 = dma.hbm_to_vmem [thread:$0]  (!%p1489_p12), %s1592_s3, 1024, %s268_s26, [#allocation3], %s1375_s22, %s1375_s22, %s1376_s25  }
  0x2d   : > { %s1377_s23 = smov [#allocation7]  }
  0x2e   : > { %s299_s28 = sshll.u32 %s1377_s23, 4  ;;  %s300_s28 = int_to_ptr.vmem [resolvable:$true] %s299_s28 }
  0x2f   : > { %s1286_s29 = scalar_lea.vmem %s300_s28, 2048  ;;  %p1294_p9 = scmp.lt.s32.totalorder %s300_s28, %s300_s28 }
  0x30   : > { %p1287_p4 = scmp.ne.s32.totalorder %s300_s28, %s1286_s29  ;;  %p1295_p8 = scmp.lt.s32.totalorder %s1286_s29, %s1286_s29 }
  0x32   : > { %p1289_p7 = pnand %p1287_p4, %p1225_p13  ;;  %p1296_p11 = por %p1295_p8, %p1294_p9 }
  0x34   : > { %p1290_p6 = pneg %p1289_p7 }
  0x36   : > { %p1297_p0 = pnand %p1296_p11, %p1290_p6 }
  0x38   : > { %1300 = shalt.err (!%p1297_p0)
}
  0x39   : > { %1121 = dma.hbm_to_vmem [thread:$0]  (!%p1489_p12), %s1596_s7, 2048, %s300_s28, [#allocation6], %s1375_s22, %s1375_s22, %s1376_s25  }
  0x3a   : > { %325 = sbr.rel (%p1481_p10) target bundleno = 888 (0x378), region = 56  ;;  %p1605_p1 = scmp.eq.s32.totalorder (!%p1481_p10), %s1453_s13, 0 }
  0x3f   : > { %1344 = dma.done.wait (%p1605_p1), [#allocation3], 1024   ;;  %p1606_p13 = pmov %p1605_p1 }
  0x40   : > { %p1607_p3 = pmov %p1605_p1 }
  0x41   : > { %1346 = vsyncadd (%p1606_p13), [#allocation3], 4294966272 }
  0x42   : > { %1348 = dma.done.wait (%p1607_p3), [#allocation6], 4096   ;;  %p1608_p2 = pmov %p1605_p1 }
  0x43   : > { %p368_p4 = scmp.lt.s32.totalorder %s1453_s13, 1  ;;  %v1378_v0 = vmov 0.0   ;;  %vm1379_vm0 = vmmov 0   ;;  %vm387_vm1 = vcmask 1043456   ;;  %v375_v1 = vld [vmem:[%s1590_s1] sm:$0xf]  ;;  %v564_v62 = vlaneseq }
  0x44   : > { %1350 = vsyncadd (%p1608_p2), [#allocation6], 4294963200  ;;  %1072 = vmatprep.subr.bf16.mxu0 %v1378_v0  ;;  %1074 = vmatprep.mubr.msk.bf16.mxu0 %vm1379_vm0, %v1378_v0  ;;  %v389_v3 = vsel %vm387_vm1, %v375_v1, 0  ;;  %v1175_v5 = vld [vmem:[#allocation2 + $0x38] sm:$0xff]   ;;  %vm383_vm2 = vcmask 64512   ;;  %v1176_v6 = vld [vmem:[#allocation2 + $0x30] sm:$0xff]  }
  0x45   : > { %s369_s18 = scalar_select %p368_p4, %s1453_s13, 1  ;;  %1078 = vmatprep.subr.bf16.mxu1 %v1378_v0  ;;  %1094 = vmatprep.mubr.msk.bf16.mxu1 %vm1379_vm0, %v1378_v0  ;;  %v1177_v7 = vld [vmem:[#allocation2 + $0x28] sm:$0xff]   ;;  %v1178_v8 = vld [vmem:[#allocation2 + $0x20] sm:$0xff]   ;;  %v1179_v9 = vld [vmem:[#allocation2 + $0x18] sm:$0xff]   ;;  %v1380_v37 = vmov 0   ;;  %v565_v63 = vshrl.u32 %v564_v62, 7 }
  0x46   : > { %1073 = vmatpush3.bf16.msra.mxu0 %v389_v3  ;;  %1079 = vmatpush3.bf16.msra.mxu1 %v1175_v5  ;;  %v1180_v10 = vld [vmem:[#allocation2 + $0x10] sm:$0xff]   ;;  %v1181_v11 = vld [vmem:[#allocation2 + $0x8] sm:$0xff]   ;;  %v1182_v12 = vld [vmem:[#allocation2] sm:$0xff]  }
  0x47   : > { %s990_s21 = sshll.u32 %s369_s18, 3  ;;  %1080 = vmatprep.subr.bf16.mxu1 %v1378_v0  ;;  %v1183_v13 = vld [vmem:[#allocation5 + $0x70] ss:$8 sps:$4 sm:$0xff]   ;;  %v1185_v14 = vld [vmem:[#allocation5 + $0x74] ss:$8 sps:$4 sm:$0xff]   ;;  %v1211_v42 = vld [vmem:[#allocation7 + $0x68] sm:$0xff]  }
  0x48   : > { %s371_s17 = scalar_lea.vmem %s1589_s0, %s990_s21  ;;  %v1188_v15 = vld [vmem:[#allocation5 + $0x64] ss:$8 sps:$4 sm:$0xff]   ;;  %654 = vmatprep.subr.bf16.mxu0 %v1185_v14  ;;  %v1186_v16 = vld [vmem:[#allocation5 + $0x60] ss:$8 sps:$4 sm:$0xff]   ;;  %v1191_v17 = vld [vmem:[#allocation5 + $0x54] ss:$8 sps:$4 sm:$0xff]  }
  0x49   : > { %v373_v2 = vld [vmem:[%s371_s17] sm:$0xff]  ;;  %v1189_v18 = vld [vmem:[#allocation5 + $0x50] ss:$8 sps:$4 sm:$0xff]   ;;  %v1197_v21 = vld [vmem:[#allocation5 + $0x34] ss:$8 sps:$4 sm:$0xff]   ;;  %s365_s18 = sand.u32 1, %s1361_s10  }
  0x4a   : > { %v374_v4 = vpack.c.bf16 %v373_v2, %v373_v2  ;;  %1081 = vmatpush3.bf16.msra.mxu1 %v1176_v6  ;;  %v1194_v19 = vld [vmem:[#allocation5 + $0x44] ss:$8 sps:$4 sm:$0xff]   ;;  %v1192_v20 = vld [vmem:[#allocation5 + $0x40] ss:$8 sps:$4 sm:$0xff]   ;;  %v1195_v22 = vld [vmem:[#allocation5 + $0x30] ss:$8 sps:$4 sm:$0xff]  }
  0x4b   : > { %1082 = vmatprep.subr.bf16.mxu1 %v1378_v0  ;;  %v1200_v23 = vld [vmem:[#allocation5 + $0x24] ss:$8 sps:$4 sm:$0xff]   ;;  %v1198_v24 = vld [vmem:[#allocation5 + $0x20] ss:$8 sps:$4 sm:$0xff]   ;;  %v1203_v25 = vld [vmem:[#allocation5 + $0x14] ss:$8 sps:$4 sm:$0xff]  }
  0x4c   : > { %1075 = vmatmul.mubr.msk.bf16.vlgmr.msra.gmra.mxu0 %vm383_vm2, %v374_v4  ;;  %v1201_v26 = vld [vmem:[#allocation5 + $0x10] ss:$8 sps:$4 sm:$0xff]   ;;  %v991_v27 = vld [vmem:[%s1591_s2] ss:$0 sm:$0xff]  ;;  %v1206_v35 = vld [vmem:[#allocation5 + $0x4] ss:$8 sps:$4 sm:$0xff]  }
  0x4d   : > { %655 = vmatpush1.bf16.msra.mxu0 %v1183_v13  ;;  %v1204_v36 = vld [vmem:[#allocation5] ss:$8 sps:$4 sm:$0xff]   ;;  %686 = vmatprep.mubr.bf16.mxu0 %v1380_v37  ;;  %v1207_v38 = vld [vmem:[#allocation7 + $0x78] sm:$0xff]   ;;  %v1209_v40 = vld [vmem:[#allocation7 + $0x70] sm:$0xff]   ;;  %v570_v2 = vsub.s32 1, %v565_v63  ;;  %s989_s21 = sshll.u32 %s365_s18, 3 }
  0x4e   : > { %1083 = vmatpush3.bf16.msra.mxu1 %v1177_v7  ;;  %656 = vmatprep.subr.bf16.mxu0 %v1188_v15  ;;  %v1208_v39 = vld [vmem:[#allocation7 + $0x38] sm:$0xff]   ;;  %v1210_v41 = vld [vmem:[#allocation7 + $0x30] sm:$0xff]   ;;  %v1212_v43 = vld [vmem:[#allocation7 + $0x28] sm:$0xff]   ;;  %s1036_s17 = sshll.u32 %s1453_s13, 7  ;;  %s367_s22 = scalar_lea.vmem [#allocation8], %s989_s21 }
  0x4f   : > { %1084 = vmatprep.subr.bf16.mxu1 %v1378_v0  ;;  %v1213_v44 = vld [vmem:[#allocation7 + $0x60] sm:$0xff]   ;;  %v1215_v46 = vld [vmem:[#allocation7 + $0x58] sm:$0xff]   ;;  %v1217_v48 = vld [vmem:[#allocation7 + $0x50] sm:$0xff]   ;;  %s889_s25 = sshll.u32 %s367_s22, 4  ;;  %s1554_s28 = scalar_lea.hbm %s1598_s9, %s1036_s17  ;;  %s890_s25 = int_to_ptr.vmem [resolvable:$true] %s889_s25 }
  0x50   : > { %v1214_v45 = vld [vmem:[#allocation7 + $0x20] sm:$0xff]   ;;  %v1216_v47 = vld [vmem:[#allocation7 + $0x18] sm:$0xff]   ;;  %v1218_v49 = vld [vmem:[#allocation7 + $0x10] sm:$0xff]   ;;  %s876_s29 = scalar_lea.sflag [#allocation4], %s365_s18  ;;  %s1301_s14 = scalar_lea.vmem %s890_s25, 128 }
  0x51   : > { %657 = vmatpush1.bf16.msra.mxu0 %v1186_v16  ;;  %v993_v50 = vld [vmem:[%s1593_s4] ss:$0 sm:$0xff]  ;;  %v1219_v58 = vld [vmem:[#allocation7 + $0x48] sm:$0xff]   ;;  %p1302_p10 = scmp.ne.s32.totalorder %s890_s25, %s1301_s14  ;;  %s1381_s13 = smov [#allocation8]  }
  0x52   : > { %1085 = vmatpush3.bf16.msra.mxu1 %v1178_v8  ;;  %658 = vmatprep.subr.bf16.mxu0 %v1191_v17  ;;  %v1220_v59 = vld [vmem:[#allocation7 + $0x8] sm:$0xff]   ;;  %v1221_v60 = vld [vmem:[#allocation7 + $0x40] sm:$0xff]   ;;  %s1305_s16 = sshll.u32 %s1381_s13, 4  ;;  %s1306_s16 = int_to_ptr.vmem [resolvable:$false] %s1305_s16 }
  0x53   : > { %1086 = vmatprep.subr.bf16.mxu1 %v1378_v0  ;;  %v1222_v61 = vld [vmem:[#allocation7] sm:$0xff]   ;;  %p1303_p12 = pnand %p1302_p10, %p1470_p5  ;;  %s1307_s21 = scalar_lea.vmem %s1306_s16, 256 }
  0x54   : > { %v562_v1 = vld [vmem:[%s1595_s6] sm:$0x3]  ;;  %p1308_p6 = scmp.lt.s32.totalorder %s890_s25, %s1306_s16  ;;  %p1309_p9 = scmp.lt.s32.totalorder %s1307_s21, %s1301_s14 }
  0x55   : > { %659 = vmatpush1.bf16.msra.mxu0 %v1189_v18  ;;  %v571_v4 = vrot.slane %v562_v1, %v570_v2  ;;  %v1018_v16 = vld [vmem:[%s1597_s8] ss:$0 sm:$0xff]  ;;  %p1304_p7 = pneg %p1303_p12 }
  0x56   : > { %1087 = vmatpush3.bf16.msra.mxu1 %v1179_v9  ;;  %660 = vmatprep.subr.bf16.mxu0 %v1194_v19  ;;  %p1310_p8 = por %p1309_p9, %p1308_p6 }
  0x57   : > { %1088 = vmatprep.subr.bf16.mxu1 %v1378_v0 }
  0x58   : > { %p1311_p11 = pnand %p1310_p8, %p1304_p7 }
  0x59   : > { %661 = vmatpush1.bf16.msra.mxu0 %v1192_v20 }
  0x5a   : > { %1089 = vmatpush3.bf16.msra.mxu1 %v1180_v10  ;;  %662 = vmatprep.subr.bf16.mxu0 %v1197_v21 }
  0x5b   : > { %1090 = vmatprep.subr.bf16.mxu1 %v1378_v0 }
  0x5d   : > { %663 = vmatpush1.bf16.msra.mxu0 %v1195_v22 }
  0x5e   : > { %1091 = vmatpush3.bf16.msra.mxu1 %v1181_v11  ;;  %664 = vmatprep.subr.bf16.mxu0 %v1200_v23 }
  0x5f   : > { %1092 = vmatprep.subr.bf16.mxu1 %v1378_v0  ;;  %v566_v0 = vsub.s32 0, %v565_v63 }
  0x61   : > { %665 = vmatpush1.bf16.msra.mxu0 %v1198_v24  ;;  %v567_v3 = vrot.slane %v562_v1, %v566_v0 }
  0x62   : > { %1093 = vmatpush3.bf16.msra.mxu1 %v1182_v12  ;;  %666 = vmatprep.subr.bf16.mxu0 %v1203_v25 }
  0x63   : > { %1050 = vmatprep.subr.bf16.mxu1 %v1207_v38 }
  0x65   : > { %667 = vmatpush1.bf16.msra.mxu0 %v1201_v26 }
  0x66   : > { %668 = vmatprep.subr.bf16.mxu0 %v1206_v35 }
  0x69   : > { %669 = vmatpush1.bf16.msra.mxu0 %v1204_v36 }
 0x10c   : > { %v425_v28 = vpop.f32.mrf.mxu0 }
 0x10d   : > { %v426_v29 = vadd.f32 %v991_v27, %v425_v28 }
 0x10e   : > { %v1076_v30 = vpop.f32.mrf.mxu0 }
 0x10f   : > { %v431_v31 = vmax.f32 %v426_v29, 0.0 }
 0x110   : > { %v428_v32 = vpop.f32.mrf.mxu0 }
 0x111   : > { %v432_v33 = vpack.c.bf16 %v431_v31, %v431_v31 }
 0x112   : > { %v1077_v34 = vpop.f32.mrf.mxu0 }
 0x113   : > { %1095 = vmatmul.mubr.bf16.vlgmr.msra.gmra.mxu1 %v432_v33 }
 0x114   : > { %1051 = vmatpush3.bf16.msra.mxu1 %v1208_v39 }
 0x115   : > { %1052 = vmatprep.subr.bf16.mxu1 %v1209_v40 }
 0x118   : > { %1053 = vmatpush3.bf16.msra.mxu1 %v1210_v41 }
 0x119   : > { %1054 = vmatprep.subr.bf16.mxu1 %v1211_v42 }
 0x11c   : > { %1055 = vmatpush3.bf16.msra.mxu1 %v1212_v43 }
 0x11d   : > { %1056 = vmatprep.subr.bf16.mxu1 %v1213_v44 }
 0x120   : > { %1057 = vmatpush3.bf16.msra.mxu1 %v1214_v45 }
 0x121   : > { %1058 = vmatprep.subr.bf16.mxu1 %v1215_v46 }
 0x124   : > { %1059 = vmatpush3.bf16.msra.mxu1 %v1216_v47 }
 0x125   : > { %1060 = vmatprep.subr.bf16.mxu1 %v1217_v48 }
 0x128   : > { %1061 = vmatpush3.bf16.msra.mxu1 %v1218_v49 }
 0x129   : > { %1062 = vmatprep.subr.bf16.mxu1 %v1219_v58 }
 0x12c   : > { %1063 = vmatpush3.bf16.msra.mxu1 %v1220_v59 }
 0x12d   : > { %1064 = vmatprep.subr.bf16.mxu1 %v1221_v60 }
 0x130   : > { %1065 = vmatpush3.bf16.msra.mxu1 %v1222_v61 }
 0x1d3   : > { %v538_v51 = vpop.f32.mrf.mxu1 }
 0x1d4   : > { %v539_v52 = vadd.f32 %v993_v50, %v538_v51 }
 0x1d5   : > { %v1096_v53 = vpop.f32.mrf.mxu1 }
 0x1d6   : > { %v544_v54 = vmax.f32 %v539_v52, 0.0 }
 0x1d7   : > { %v541_v55 = vpop.f32.mrf.mxu1 }
 0x1d8   : > { %v545_v56 = vpack.c.bf16 %v544_v54, %v544_v54 }
 0x1d9   : > { %v1097_v57 = vpop.f32.mrf.mxu1 }
 0x1da   : > { %687 = vmatmul.mubr.bf16.vlgmr.msra.gmra.mxu0 %v545_v56 }
 0x29a   : > { %v688_v5 = vpop.f32.mrf.mxu0 }
 0x29b   : > { %v689_v6 = vadd.f32 %v688_v5, %v567_v3 }
 0x29c   : > { %v690_v7 = vpop.f32.mrf.mxu0 }
 0x29d   : > { %v691_v8 = vadd.f32 %v690_v7, %v571_v4  ;;  %v695_v9 = vmax.f32 %v689_v6, 0.0 }
 0x29e   : > { %v692_v10 = vpop.f32.mrf.mxu0 }
 0x29f   : > { %v696_v11 = vmax.f32 %v691_v8, 0.0  ;;  %v697_v14 = vpack.c.bf16 %v695_v9, %v695_v9 }
 0x2a0   : > { %v693_v12 = vpop.f32.mrf.mxu0 }
 0x2a1   : > { %v698_v13 = vpack.c.bf16 %v696_v11, %v696_v11 }
 0x2a3   : > { %866 = vmatprep.mubr.bf16.mxu1 %v698_v13 }
 0x2a4   : > { %867 = vmatmul.mubr.bf16.vlgmr.msra.gmra.mxu1 %v697_v14 }
 0x364   : > { %v1066_v15 = vpop.f32.mrf.mxu1 }
 0x366   : > { %v1067_v17 = vpop.f32.mrf.mxu1 }
 0x367   : > { %v1068_v18 = vadd.f32 %v1067_v17, %v1066_v15 }
 0x368   : > { %v1069_v19 = vpop.f32.mrf.mxu1 }
 0x369   : > { %v869_v20 = vadd.f32 %v1068_v18, %v1018_v16 }
 0x36a   : > { %v1070_v21 = vpop.f32.mrf.mxu1 }
 0x36b   : > { %874 = vst [vmem:[%s367_s22] sm:$0xff] %v869_v20 }
 0x36c   : > { %1314 = shalt.err (!%p1311_p11)
}
 0x36d   : > { %s1315_s24 = scalar_lea.hbm %s1554_s28, 128  ;;  %s1319_s17 = scalar_lea.hbm %s1598_s9, 256 }
 0x36e   : > { %p1316_p0 = scmp.ne.s32.totalorder %s1554_s28, %s1315_s24  ;;  %p1320_p3 = scmp.lt.s32.totalorder %s1554_s28, %s1598_s9 }
 0x36f   : > { %p1321_p2 = scmp.lt.s32.totalorder %s1319_s17, %s1315_s24 }
 0x370   : > { %p1317_p1 = pnand %p1316_p0, %p1470_p5 }
 0x371   : > { %p1322_p4 = por %p1321_p2, %p1320_p3 }
 0x372   : > { %p1318_p13 = pneg %p1317_p1 }
 0x374   : > { %p1323_p10 = pnand %p1322_p4, %p1318_p13 }
 0x376   : > { %1326 = shalt.err (!%p1323_p10)
}
 0x377   : > { %1110 = dma.vmem_to_hbm [thread:$0]  (%p1470_p5), %s890_s25, 128, %s1554_s28, %s876_s29  }
 0x378 PF: > { %p1132_p12 = scmp.ge.s32.totalorder %s1369_s12, 2  ;;  %s901_s23 = sand.u32 1, %s1357_s30  }
 0x379   : > { %p1609_p7 = scmp.ne.s32.totalorder %s1602_s20, 0  ;;  %s902_s14 = scalar_lea.sflag [#allocation4], %s901_s23 }
 0x37b   : > { %p1123_p6 = pnand %p1132_p12, %p1609_p7 }
 0x37d   : > { %p1124_p9 = pneg %p1123_p6 }
 0x37f   : > { %1352 = dma.done.wait (%p1124_p9), %s902_s14, 128  }
 0x380   : > { %1354 = vsyncadd (%p1124_p9), %s902_s14, 4294967168  ;;  %s1610_s13 = sld [smem:[#allocation12_spill]]  ;;  %p21_p8 = scmp.ge.s32.totalorder %s1457_s15, 4  }
 0x381   : > { %s1611_s30 = smov %s1361_s10  ;;  %s1612_s10 = smov %s1365_s11 }
 0x382   : > { %s1614_s12 = smov %s1457_s15  ;;  %23 = sbr.rel (!%p21_p8) target bundleno = 5 (0x5), region = 104 }
 0x386   : > { %s1613_s11 = smov %s1610_s13 }
 0x387   :  { %907 = vsyncpa [#allocation3], 1 }
 0x388   :  { %909 = vsyncpa [#allocation3 + $0x1], 1 }
 0x389   :  { %910 = vsyncpa [#allocation6], 1 }
 0x38a   :  { %911 = vsyncpa [#allocation4], 1 }
 0x38b   :  { %913 = vsyncpa [#allocation4 + $0x1], 1 }

</bundles_post_ra>
